<compile_context>
chip_gen: v7x
topology: tpu7x:2x2x1
jax: 0.10.0
libtpu: 0.0.40
codegen_flags: <defaults>
</compile_context>

<pallas_src>
import functools

import numpy as np

import jax
import jax.numpy as jnp
from jax.experimental import pallas as pl
from jax.experimental.pallas import tpu as pltpu  # noqa: F401  (TPU backend)

PAD = 128      # lane width; every batch size must fit in one lane tile
N_ROWS = 16    # 4 score rows + 4 'a' rows + 4 'b' rows + 4 zero rows


def _decouple_kernel(slab_ref, out_ref):
    """slab rows: [0:4] scores x, [4:8] a = y*scale, [8:12] b = (1-y)*scale."""
    x = slab_ref[0:4, :]
    a = slab_ref[4:8, :]
    b = slab_ref[8:12, :]

    # BCE with torch-style -100 clamp on the log terms.  Padding lanes have
    # a == b == 0, so they contribute nothing (scores are padded with 0.5 so
    # the logs stay finite).
    log_x = jnp.maximum(jnp.log(x), -100.0)
    log_1mx = jnp.maximum(jnp.log(1.0 - x), -100.0)
    loss = -jnp.sum(a * log_x + b * log_1mx)

    # Lane-dense (1, 128) output row: unmasked store; wrapper reads [0, 0].
    out_ref[...] = jnp.broadcast_to(loss, (1, PAD))


def _decouple_loss_fwd(ee, ss, es, se, label, scale, *, batch_nor, n_full,
                       n_half2):
    """Jitted wrapper: builds the stacked slab (fuses into XLA) + pallas_call."""
    label = label.astype(jnp.float32)
    normal = label[:batch_nor]
    t2 = jnp.concatenate([normal, normal], axis=0)

    pad_full = PAD - n_full
    pad_half = PAD - n_half2

    # Scores, padded with 0.5 (log-safe; padded lanes are zeroed by scale).
    x = jnp.stack([
        jnp.pad(ee.astype(jnp.float32), (0, pad_full), constant_values=0.5),
        jnp.pad(ss.astype(jnp.float32), (0, pad_half), constant_values=0.5),
        jnp.pad(es.astype(jnp.float32), (0, pad_half), constant_values=0.5),
        jnp.pad(se.astype(jnp.float32), (0, pad_half), constant_values=0.5),
    ])                                                  # (4, 128)
    # Targets, padded with 0.
    y = jnp.stack([
        jnp.pad(label, (0, pad_full)),
        jnp.pad(t2, (0, pad_half)),
        jnp.pad(t2, (0, pad_half)),
        jnp.pad(t2, (0, pad_half)),
    ])                                                  # (4, 128)

    # scale already carries w_i / n_i on valid lanes and 0 on padding lanes,
    # so a and b fold the weight, the mean divisor and the mask in one go.
    a = y * scale
    b = (1.0 - y) * scale

    slab = jnp.concatenate(
        [x, a, b, jnp.zeros((4, PAD), jnp.float32)], axis=0)   # (16, 128)

    out = pl.pallas_call(
        _decouple_kernel,
        out_shape=jax.ShapeDtypeStruct((1, PAD), jnp.float32),
        in_specs=[pl.BlockSpec((N_ROWS, PAD), lambda: (0, 0))],
        out_specs=pl.BlockSpec((1, PAD), lambda: (0, 0)),
    )(slab)
    return out[0, 0]


class DecoupleLossPallas:
    """JAX/Pallas equivalent of the PyTorch Decouple_Loss forward pass."""

    def __init__(self, batch_nor, batch_abn, w_bag):
        self.batch_nor = int(batch_nor)
        self.batch_abn = int(batch_abn)
        self.w_bag = tuple(float(w) for w in w_bag)
        assert len(self.w_bag) == 4, "w_bag must have 4 weights"

        n_full = self.batch_nor + self.batch_abn
        n_half2 = 2 * self.batch_nor
        assert 0 < n_full <= PAD and 0 < n_half2 <= PAD, (
            f"batch sizes (n_full={n_full}, n_half2={n_half2}) must be in "
            f"(0, {PAD}]")
        self.n_full = n_full
        self.n_half2 = n_half2

        # Trace-time constant: scale[i, lane] = w_i / n_i on valid lanes, else 0.
        scale = np.zeros((4, PAD), np.float32)
        scale[0, :n_full] = self.w_bag[0] / n_full
        scale[1, :n_half2] = self.w_bag[1] / n_half2
        scale[2, :n_half2] = self.w_bag[2] / n_half2
        scale[3, :n_half2] = self.w_bag[3] / n_half2
        self._scale = jnp.asarray(scale)

        # jit the whole forward so slab construction fuses with the kernel call.
        self._fwd = jax.jit(functools.partial(
            _decouple_loss_fwd, batch_nor=self.batch_nor,
            n_full=n_full, n_half2=n_half2))

    def __call__(self, result, label):
        ee = result['bag_score_ee']
        ss = result['bag_score_ss']
        es = result['bag_score_es']
        se = result['bag_score_se']
        # Clear shape validation (review correctness concern).
        assert label.shape == (self.n_full,), (
            f"label must have shape ({self.n_full},), got {label.shape}")
        assert ee.shape == (self.n_full,), (
            f"bag_score_ee must have shape ({self.n_full},), got {ee.shape}")
        for name, arr in (('bag_score_ss', ss), ('bag_score_es', es),
                          ('bag_score_se', se)):
            assert arr.shape == (self.n_half2,), (
                f"{name} must have shape ({self.n_half2},), got {arr.shape}")
        return self._fwd(ee, ss, es, se, label, self._scale)


def _reference(result, label, batch_nor, w_bag):
    """Pure-JAX reference mirroring torch.nn.BCELoss."""
    def bce(x, y):
        log_x = jnp.maximum(jnp.log(x), -100.0)
        log_1mx = jnp.maximum(jnp.log(1.0 - x), -100.0)
        return jnp.mean(-(y * log_x + (1.0 - y) * log_1mx))

    normal_label = label[:batch_nor]
    t2 = jnp.concatenate([normal_label, normal_label], axis=0)
    losses = [bce(result['bag_score_ee'], label),
              bce(result['bag_score_ss'], t2),
              bce(result['bag_score_es'], t2),
              bce(result['bag_score_se'], t2)]
    return sum(w * l for w, l in zip(w_bag, losses))


if __name__ == "__main__":
    batch_nor = 4
    batch_abn = 4
    w_bag = [0.4, 0.3, 0.2, 0.1]

    key = jax.random.PRNGKey(0)
    k_ee, k_ss, k_es, k_se, _ = jax.random.split(key, 5)

    n_full = batch_nor + batch_abn   # 8
    n_half2 = 2 * batch_nor          # 8

    # bag scores are probabilities in (0, 1)
    result = {
        'bag_score_ee': jax.nn.sigmoid(jax.random.normal(k_ee, (n_full,), jnp.float32)),
        'bag_score_ss': jax.nn.sigmoid(jax.random.normal(k_ss, (n_half2,), jnp.float32)),
        'bag_score_es': jax.nn.sigmoid(jax.random.normal(k_es, (n_half2,), jnp.float32)),
        'bag_score_se': jax.nn.sigmoid(jax.random.normal(k_se, (n_half2,), jnp.float32)),
    }
    # binary labels: first batch_nor "normal" (0), rest "abnormal" (1).
    label = jnp.concatenate([jnp.zeros((batch_nor,), jnp.float32),
                             jnp.ones((batch_abn,), jnp.float32)])

    loss_fn = DecoupleLossPallas(batch_nor, batch_abn, w_bag)
    loss = loss_fn(result, label)
    jax.block_until_ready(loss)

    ref = _reference(result, label, batch_nor, w_bag)
    assert jnp.allclose(loss, ref, rtol=1e-5, atol=1e-5), (loss, ref)

    print("KERNEL_OK")
</pallas_src>

<mosaic_0001>
module attributes {stable_mosaic.version = 11 : i64} {
  func.func @_decouple_kernel(%arg0: memref<16x128xf32, #tpu.memory_space<vmem>>, %arg1: memref<1x128xf32, #tpu.memory_space<vmem>>) attributes {dimension_semantics = [], scalar_prefetch = 0 : i64, scratch_operands = 0 : i64, tpu.core_type = #tpu.core_type<tc>} {
    %c0 = arith.constant 0 : index
    %c0_0 = arith.constant 0 : index
    %0 = vector.load %arg0[%c0, %c0_0] : memref<16x128xf32, #tpu.memory_space<vmem>>, vector<4x128xf32>
    %c4 = arith.constant 4 : index
    %c0_1 = arith.constant 0 : index
    %1 = vector.load %arg0[%c4, %c0_1] : memref<16x128xf32, #tpu.memory_space<vmem>>, vector<4x128xf32>
    %c8 = arith.constant 8 : index
    %c0_2 = arith.constant 0 : index
    %2 = vector.load %arg0[%c8, %c0_2] : memref<16x128xf32, #tpu.memory_space<vmem>>, vector<4x128xf32>
    %3 = math.log %0 : vector<4x128xf32>
    %cst = arith.constant -1.000000e+02 : f32
    %4 = vector.broadcast %cst : f32 to vector<4x128xf32>
    %5 = arith.maximumf %3, %4 : vector<4x128xf32>
    %cst_3 = arith.constant 1.000000e+00 : f32
    %6 = vector.broadcast %cst_3 : f32 to vector<4x128xf32>
    %7 = arith.subf %6, %0 : vector<4x128xf32>
    %8 = math.log %7 : vector<4x128xf32>
    %cst_4 = arith.constant -1.000000e+02 : f32
    %9 = vector.broadcast %cst_4 : f32 to vector<4x128xf32>
    %10 = arith.maximumf %8, %9 : vector<4x128xf32>
    %11 = arith.mulf %1, %5 : vector<4x128xf32>
    %12 = arith.mulf %2, %10 : vector<4x128xf32>
    %13 = arith.addf %11, %12 : vector<4x128xf32>
    %14 = vector.shape_cast %13 : vector<4x128xf32> to vector<1x4x128xf32>
    %cst_5 = arith.constant dense<0.000000e+00> : vector<1xf32>
    %15 = vector.multi_reduction <add>, %14, %cst_5 [1, 2] : vector<1x4x128xf32> to vector<1xf32>
    %16 = vector.shape_cast %15 : vector<1xf32> to vector<1x1x1xf32>
    %17 = vector.extract %16[0, 0, 0] : f32 from vector<1x1x1xf32>
    %cst_6 = arith.constant 0.000000e+00 : f32
    %18 = arith.subf %cst_6, %17 : f32
    %19 = vector.broadcast %18 : f32 to vector<1x128xf32>
    %c0_7 = arith.constant 0 : index
    %c0_8 = arith.constant 0 : index
    %20 = vector.load %arg1[%c0_7, %c0_8] : memref<1x128xf32, #tpu.memory_space<vmem>>, vector<1x128xf32>
    tpu.vector_store %arg1[%c0_7, %c0_8], %19 {strides = array<i32>} : memref<1x128xf32, #tpu.memory_space<vmem>>, vector<1x128xf32>,
    return
  }
}

</mosaic_0001>

<bundles_post_ra>
// kernel: _decouple_loss_fwd.1
= control target key start
LH: loop header
LB: loop body
LE: loop exit
PB: predicated region body
PF: predicated region fallthrough
CT: control target
= control target key end

     0   :  { %s113_s0 = inlined_call_operand.vmem [shape: f32[16,128], index: 0, kind: input, shape index: {}]   ;;  %s114_s1 = inlined_call_operand.hbm [shape: f32[1,128], index: 1, kind: output, shape index: {}]  }
   0x1   :  { %v9_v0 = vld [vmem:[%s113_s0] sm:$0xf] }
   0x2   :  { %53 = vlog2.f32 %v9_v0  ;;  %v15_v1 = vsub.f32 1.0, %v9_v0 }
   0x3   :  { %6 = vsyncpa [#allocation3], 0  ;;  %v10_v5 = vld [vmem:[%s113_s0 + $0x4] sm:$0xf]  ;;  %v11_v8 = vld [vmem:[%s113_s0 + $0x8] sm:$0xf] }
   0x4   :  { %55 = vlog2.f32 %v15_v1  ;;  %vm22_vm0 = vcmask 1043456   ;;  %s81_s12 = smov [#allocation2]  }
   0x5   :  { %s42_s13 = sshll.u32 %s81_s12, 4  ;;  %s43_s13 = int_to_ptr.vmem [resolvable:$true] %s42_s13 }
   0x6   :  { %s57_s0 = scalar_lea.vmem %s43_s13, 16  ;;  %s61_s16 = scalar_lea.vmem %s43_s13, 32 }
   0x7   :  { %p58_p0 = scmp.ne.s32.totalorder %s43_s13, %s57_s0  ;;  %p62_p1 = scmp.lt.s32.totalorder %s43_s13, %s43_s13 }
   0x8   :  { %p63_p2 = scmp.lt.s32.totalorder %s61_s16, %s57_s0 }
   0xa   :  { %p64_p3 = por %p63_p2, %p62_p1 }
   0xc   :  { %v54_v2 = vpop.eup %53  ;;  %p65_p4 = pnand %p64_p3, %p58_p0 }
   0xd   :  { %v13_v3 = vmul.f32 0.6931472, %v54_v2 }
   0xe   :  { %v56_v4 = vpop.eup %55 }
   0xf   :  { %v14_v6 = vmax.f32 %v13_v3, -100.0  ;;  %v17_v7 = vmul.f32 0.6931472, %v56_v4 }
  0x11   :  { %v18_v9 = vmax.f32 %v17_v7, -100.0  ;;  %v19_v10 = vmul.f32 %v14_v6, %v10_v5 }
  0x13   :  { %v20_v11 = vmul.f32 %v18_v9, %v11_v8 }
  0x15   :  { %v21_v12 = vadd.f32 %v20_v11, %v19_v10 }
  0x17   :  { %v23_v13 = vsel %vm22_vm0, %v21_v12, 0.0 }
  0x18   :  { %24 = vadd.xlane.f32.xlu0 %v23_v13 }
  0xa5   :  { %v25_v14 = vpop.xlane.xlu0 %24 }
  0xa6   :  { %v26_v15 = vrot.slane %v25_v14, 4 }
  0xa8   :  { %v27_v16 = vadd.f32 %v26_v15, %v25_v14 }
  0xaa   :  { %v28_v17 = vrot.slane %v27_v16, 2 }
  0xac   :  { %v29_v18 = vadd.f32 %v28_v17, %v27_v16 }
  0xae   :  { %v30_v19 = vrot.slane %v29_v18, 1 }
  0xb0   :  { %v31_v20 = vadd.f32 %v30_v19, %v29_v18 }
  0xb2   :  { %50 = vpush %v31_v20 }
  0xe3   :  { %s51_s14 = spop %50 }
  0xe4   :  { %s33_s15 = ssub.f32 0.0, %s51_s14 }
  0xe6   :  { %v34_v21 = vstv %s33_s15 }
  0xe7   :  { %35 = vst [vmem:[#allocation2] sm:$0x1] %v34_v21 }
  0xe8   :  { %68 = shalt.err (!%p65_p4)
}
  0xe9   :  { %s69_s19 = scalar_lea.hbm %s114_s1, 16 }
  0xea   :  { %p70_p5 = scmp.ne.s32.totalorder %s114_s1, %s69_s19  ;;  %p73_p6 = scmp.lt.u32.totalorder %s69_s19, %s114_s1 }
  0xec   :  { %p75_p7 = pnand %p73_p6, %p70_p5 }
  0xee   :  { %78 = shalt.err (!%p75_p7)
}
  0xef   :  { %45 = dma.vmem_to_hbm [thread:$0]  %s43_s13, 16, %s114_s1, [#allocation3]  }
  0xf0   :  { %79 = dma.done.wait [#allocation3], 16  }
  0xf1   :  { %80 = vsyncadd [#allocation3], 4294967280 }
  0xf2   :  { %49 = vsyncpa [#allocation3], 1 }

</bundles_post_ra>
